<compile_context>
chip_gen: v6e
topology: v6e:2x2x1
jax: 0.10.0
libtpu: 0.0.40
codegen_flags: <defaults>
</compile_context>

<pallas_src>
import jax
import jax.numpy as jnp
from jax.experimental import pallas as pl
from jax.experimental.pallas import tpu as pltpu

_LANE = 128


def _round_up(x, m):
    return ((x + m - 1) // m) * m


def ncf_fused_kernel(nidx_ref, didx_ref, fnT_ref, fdT_ref, b1_ref, w2_ref,
                     b2_ref, o_ref):
    # nidx_ref, didx_ref : (1, TB) int32            lane-dense index tiles
    # fnT_ref            : (H, num_names)   bf16    fused (emb @ W1) table, transposed
    # fdT_ref            : (H, num_domains) bf16    fused (emb @ W1) table, transposed
    # b1_ref             : (H, 1) f32               fc1 bias (column)
    # w2_ref             : (H, 1) f32               fc2 weight (column, VPU path)
    # b2_ref             : (1, 1) f32 in SMEM       fc2 bias scalar
    # o_ref              : (1, TB) f32              lane-dense output row
    nidx = nidx_ref[...]                       # (1, TB)
    didx = didx_ref[...]                       # (1, TB)
    tb = nidx.shape[1]
    vn = fnT_ref.shape[1]
    vd = fdT_ref.shape[1]

    # Exact row selection of the fused tables via (V, TB) one-hot on the MXU.
    n_iota = jax.lax.broadcasted_iota(jnp.int32, (vn, tb), 0)
    d_iota = jax.lax.broadcasted_iota(jnp.int32, (vd, tb), 0)
    n_oh = (n_iota == nidx).astype(fnT_ref.dtype)     # (Vn, TB) bf16
    d_oh = (d_iota == didx).astype(fdT_ref.dtype)     # (Vd, TB) bf16

    # h^T = fused_n^T @ onehot_n + fused_d^T @ onehot_d + b1     (f32 accumulate)
    h = (jnp.dot(fnT_ref[...], n_oh, preferred_element_type=jnp.float32)
         + jnp.dot(fdT_ref[...], d_oh, preferred_element_type=jnp.float32)
         + b1_ref[...])                               # (H, TB) f32
    # dropout(p=0.2) == identity at inference; relu follows.
    h = jnp.maximum(h, 0.0)

    # fc2 (H -> 1): VPU multiply + sublane reduction -> lane-dense (1, TB).
    y = jnp.sum(h * w2_ref[...], axis=0, keepdims=True) + b2_ref[0, 0]
    o_ref[...] = jax.nn.sigmoid(y) * 5.0


def _vmem_estimate(tb, vn, vd, h):
    """Rough VMEM footprint (sublane/lane padded) for one grid step."""
    def pad(r, c, itemsize):
        return _round_up(max(r, 1), 8) * _round_up(max(c, 1), _LANE) * itemsize
    resident = (pad(h, vn, 2) + pad(h, vd, 2)          # fused tables (bf16)
                + pad(h, 1, 4) + pad(h, 1, 4))         # b1, w2 (f32)
    per_tile = 2 * 2 * pad(1, tb, 4) + 2 * pad(1, tb, 4)  # idx (dbl-buf), out (dbl-buf)
    interm = pad(vn, tb, 2) + pad(vd, tb, 2) + pad(h, tb, 4)  # one-hots + h
    return resident + per_tile + interm


def _choose_tiling(b, vn, vd, h, *, max_tile=2048, vmem_budget=36 << 20):
    """Lane-dense batch tile (multiple of 128) sized for the VMEM budget."""
    tb = min(max_tile, max(_LANE, _round_up(-(-b // 2), _LANE)))
    while tb > _LANE and _vmem_estimate(tb, vn, vd, h) > vmem_budget:
        tb = max(_LANE, (tb // (2 * _LANE)) * _LANE)
    # >= 2 grid steps so v7x's two TensorCores both get a share of the batch.
    b_pad = max(_round_up(b, tb), 2 * tb)
    return tb, b_pad


def _resident_spec(shape):
    """Grid-constant block: full array, single-buffered when supported."""
    idx_map = lambda i: (0,) * len(shape)
    try:
        return pl.BlockSpec(shape, idx_map, pipeline_mode=pl.Buffered(1))
    except TypeError:  # older jax without pipeline_mode: fall back to default
        return pl.BlockSpec(shape, idx_map)


def prepare_inference_params(params):
    """Fold fc1 into the embedding tables (f32 precompute, bf16 storage)."""
    ntab = params["name_emb"].astype(jnp.float32)        # (Vn, D)
    dtab = params["dom_emb"].astype(jnp.float32)         # (Vd, D)
    w1 = params["w1"].astype(jnp.float32)                # (2D, H)
    d = ntab.shape[1]
    h = w1.shape[1]
    return {
        "fnT": (ntab @ w1[:d]).T.astype(jnp.bfloat16),   # (H, Vn)
        "fdT": (dtab @ w1[d:]).T.astype(jnp.bfloat16),   # (H, Vd)
        "b1": params["b1"].reshape(h, 1).astype(jnp.float32),   # (H, 1)
        "w2": params["w2"].reshape(h, 1).astype(jnp.float32),   # (H, 1)
        "b2": params["b2"].reshape(1, 1).astype(jnp.float32),   # (1, 1) -> SMEM
    }


def ncf_forward(name_indices, domain_indices, fused, *, max_tile=2048):
    """Pallas forward on folded params: returns rating of shape (B,)."""
    fnT, fdT = fused["fnT"], fused["fdT"]
    h_dim, vn = fnT.shape
    vd = fdT.shape[1]
    b = name_indices.shape[0]

    tb, b_pad = _choose_tiling(b, vn, vd, h_dim, max_tile=max_tile)
    num_tiles = b_pad // tb

    # Lane-dense (1, B_pad) index rows; jnp.pad (no scatter) for the remainder.
    nidx = jnp.pad(name_indices.astype(jnp.int32), (0, b_pad - b)).reshape(1, b_pad)
    didx = jnp.pad(domain_indices.astype(jnp.int32), (0, b_pad - b)).reshape(1, b_pad)

    est = _vmem_estimate(tb, vn, vd, h_dim)
    vmem_limit = int(min(48 << 20, max(32 << 20, 2 * est)))

    flops = (2 * b_pad * (vn + vd) * h_dim      # one-hot gathers of fused tables
             + 3 * b_pad * h_dim                # bias/relu/fc2 reduction
             + 4 * b_pad)
    bytes_accessed = (2 * b_pad * 4 + b_pad * 4             # indices in, out
                      + (vn + vd) * h_dim * 2               # bf16 fused tables
                      + 2 * h_dim * 4 + 4)                  # b1, w2, b2

    out = pl.pallas_call(
        ncf_fused_kernel,
        out_shape=jax.ShapeDtypeStruct((1, b_pad), jnp.float32),
        grid=(num_tiles,),
        in_specs=[
            pl.BlockSpec((1, tb), lambda i: (0, i)),          # name idx (lane-dense)
            pl.BlockSpec((1, tb), lambda i: (0, i)),          # domain idx (lane-dense)
            _resident_spec(fnT.shape),                        # fused name table^T
            _resident_spec(fdT.shape),                        # fused domain table^T
            _resident_spec(fused["b1"].shape),                # fc1 bias column
            _resident_spec(fused["w2"].shape),                # fc2 weight column
            pl.BlockSpec(memory_space=pltpu.MemorySpace.SMEM),  # fc2 bias scalar
        ],
        out_specs=pl.BlockSpec((1, tb), lambda i: (0, i)),    # lane-dense output row
        compiler_params=pltpu.CompilerParams(
            dimension_semantics=("parallel",),
            vmem_limit_bytes=vmem_limit,
        ),
        cost_estimate=pl.CostEstimate(
            flops=flops, transcendentals=b_pad, bytes_accessed=bytes_accessed),
    )(nidx, didx, fnT, fdT, fused["b1"], fused["w2"], fused["b2"])
    return out[0, :b]                            # rating.squeeze(1)


def init_params(key, num_names, num_domains, embedding_dim, hidden=64):
    # Original (f32, PyTorch-checkpoint-like) parameters; folding / bf16 cast
    # happens in prepare_inference_params so precision loss isn't compounded.
    k1, k2, k3, k4, k5, k6 = jax.random.split(key, 6)
    return {
        "name_emb": jax.random.normal(k1, (num_names, embedding_dim), jnp.float32),
        "dom_emb": jax.random.normal(k2, (num_domains, embedding_dim), jnp.float32),
        "w1": jax.random.normal(k3, (embedding_dim * 2, hidden), jnp.float32) * 0.1,
        "b1": jax.random.normal(k4, (1, hidden), jnp.float32) * 0.01,
        "w2": jax.random.normal(k5, (hidden, 1), jnp.float32) * 0.1,
        "b2": jax.random.normal(k6, (1, 1), jnp.float32) * 0.01,
    }


if __name__ == "__main__":
    num_names, num_domains, embedding_dim, batch = 10, 5, 16, 8

    key = jax.random.PRNGKey(0)
    kp, kn, kd = jax.random.split(key, 3)
    params = init_params(kp, num_names, num_domains, embedding_dim)
    fused = prepare_inference_params(params)

    name_indices = jax.random.randint(kn, (batch,), 0, num_names, jnp.int32)
    domain_indices = jax.random.randint(kd, (batch,), 0, num_domains, jnp.int32)

    rating = ncf_forward(name_indices, domain_indices, fused)
    rating = jax.block_until_ready(rating)

    # Pure-JAX reference of the ORIGINAL model math (f32 params).
    name_e = jnp.take(params["name_emb"], name_indices, axis=0)
    dom_e = jnp.take(params["dom_emb"], domain_indices, axis=0)
    c = jnp.concatenate([name_e, dom_e], axis=1)
    h = jnp.maximum(c @ params["w1"] + params["b1"], 0.0)
    ref = (jax.nn.sigmoid(h @ params["w2"] + params["b2"]) * 5.0)[:, 0]

    assert rating.shape == (batch,)
    assert jnp.allclose(rating, ref, atol=2e-2, rtol=2e-2), (
        float(jnp.max(jnp.abs(rating - ref))))

    print("KERNEL_OK")
</pallas_src>

<mosaic_0001>
module attributes {stable_mosaic.version = 11 : i64} {
  func.func @ncf_fused_kernel(%arg0: i32, %arg1: memref<1x128xi32, #tpu.memory_space<vmem>>, %arg2: memref<1x128xi32, #tpu.memory_space<vmem>>, %arg3: memref<64x10xbf16, #tpu.memory_space<vmem>>, %arg4: memref<64x5xbf16, #tpu.memory_space<vmem>>, %arg5: memref<64x1xf32, #tpu.memory_space<vmem>>, %arg6: memref<64x1xf32, #tpu.memory_space<vmem>>, %arg7: memref<1x1xf32, #tpu.memory_space<smem>>, %arg8: memref<1x128xf32, #tpu.memory_space<vmem>>) attributes {dimension_semantics = [#tpu.dimension_semantics<parallel>], iteration_bounds = array<i64: 2>, scalar_prefetch = 0 : i64, scratch_operands = 0 : i64, tpu.core_type = #tpu.core_type<tc>, window_params = [{transform_indices = @transform_0, window_bounds = array<i64: 1, 128>}, {transform_indices = @transform_1, window_bounds = array<i64: 1, 128>}, {pipeline_mode = #tpu.pipeline_mode<synchronous>, transform_indices = @transform_2, window_bounds = array<i64: 64, 10>}, {pipeline_mode = #tpu.pipeline_mode<synchronous>, transform_indices = @transform_3, window_bounds = array<i64: 64, 5>}, {pipeline_mode = #tpu.pipeline_mode<synchronous>, transform_indices = @transform_4, window_bounds = array<i64: 64, 1>}, {pipeline_mode = #tpu.pipeline_mode<synchronous>, transform_indices = @transform_5, window_bounds = array<i64: 64, 1>}, {transform_indices = @transform_6, window_bounds = array<i64: 1, 1>}, {transform_indices = @transform_7, window_bounds = array<i64: 1, 128>}]} {
    %c0 = arith.constant 0 : index
    %c0_0 = arith.constant 0 : index
    %0 = vector.load %arg1[%c0, %c0_0] : memref<1x128xi32, #tpu.memory_space<vmem>>, vector<1x128xi32>
    %c0_1 = arith.constant 0 : index
    %c0_2 = arith.constant 0 : index
    %1 = vector.load %arg2[%c0_1, %c0_2] : memref<1x128xi32, #tpu.memory_space<vmem>>, vector<1x128xi32>
    %2 = tpu.iota {dimensions = array<i32: 0>} : vector<10x128xi32>
    %3 = tpu.iota {dimensions = array<i32: 0>} : vector<5x128xi32>
    %4 = vector.broadcast %0 : vector<1x128xi32> to vector<10x128xi32>
    %5 = arith.cmpi eq, %2, %4 : vector<10x128xi32>
    %6 = arith.extui %5 : vector<10x128xi1> to vector<10x128xi32>
    %7 = arith.sitofp %6 : vector<10x128xi32> to vector<10x128xf32>
    %8 = arith.truncf %7 : vector<10x128xf32> to vector<10x128xbf16>
    %9 = vector.broadcast %1 : vector<1x128xi32> to vector<5x128xi32>
    %10 = arith.cmpi eq, %3, %9 : vector<5x128xi32>
    %11 = arith.extui %10 : vector<5x128xi1> to vector<5x128xi32>
    %12 = arith.sitofp %11 : vector<5x128xi32> to vector<5x128xf32>
    %13 = arith.truncf %12 : vector<5x128xf32> to vector<5x128xbf16>
    %c0_3 = arith.constant 0 : index
    %c0_4 = arith.constant 0 : index
    %14 = vector.load %arg3[%c0_3, %c0_4] : memref<64x10xbf16, #tpu.memory_space<vmem>>, vector<64x10xbf16>
    %cst = arith.constant dense<0.000000e+00> : vector<64x128xf32>
    %15 = tpu.matmul %14, %8, %cst {dimension_numbers = #tpu.dot_dimension_numbers<[1], [0], [0], [1], [0, 0, 1, 1], [], []>} : vector<64x10xbf16>, vector<10x128xbf16>, vector<64x128xf32> -> vector<64x128xf32>
    %c0_5 = arith.constant 0 : index
    %c0_6 = arith.constant 0 : index
    %16 = vector.load %arg4[%c0_5, %c0_6] : memref<64x5xbf16, #tpu.memory_space<vmem>>, vector<64x5xbf16>
    %cst_7 = arith.constant dense<0.000000e+00> : vector<64x128xf32>
    %17 = tpu.matmul %16, %13, %cst_7 {dimension_numbers = #tpu.dot_dimension_numbers<[1], [0], [0], [1], [0, 0, 1, 1], [], []>} : vector<64x5xbf16>, vector<5x128xbf16>, vector<64x128xf32> -> vector<64x128xf32>
    %18 = arith.addf %15, %17 : vector<64x128xf32>
    %c0_8 = arith.constant 0 : index
    %c0_9 = arith.constant 0 : index
    %19 = vector.load %arg5[%c0_8, %c0_9] : memref<64x1xf32, #tpu.memory_space<vmem>>, vector<64x1xf32>
    %20 = vector.broadcast %19 : vector<64x1xf32> to vector<64x128xf32>
    %21 = arith.addf %18, %20 : vector<64x128xf32>
    %cst_10 = arith.constant 0.000000e+00 : f32
    %22 = vector.broadcast %cst_10 : f32 to vector<64x128xf32>
    %23 = arith.maximumf %21, %22 : vector<64x128xf32>
    %c0_11 = arith.constant 0 : index
    %c0_12 = arith.constant 0 : index
    %24 = vector.load %arg6[%c0_11, %c0_12] : memref<64x1xf32, #tpu.memory_space<vmem>>, vector<64x1xf32>
    %25 = vector.broadcast %24 : vector<64x1xf32> to vector<64x128xf32>
    %26 = arith.mulf %23, %25 : vector<64x128xf32>
    %cst_13 = arith.constant dense<0.000000e+00> : vector<128xf32>
    %27 = vector.multi_reduction <add>, %26, %cst_13 [0] : vector<64x128xf32> to vector<128xf32>
    %28 = vector.shape_cast %27 : vector<128xf32> to vector<1x128xf32>
    %c0_14 = arith.constant 0 : index
    %c0_15 = arith.constant 0 : index
    %29 = memref.load %arg7[%c0_14, %c0_15] : memref<1x1xf32, #tpu.memory_space<smem>>
    %30 = vector.broadcast %29 : f32 to vector<1x128xf32>
    %31 = arith.addf %28, %30 : vector<1x128xf32>
    %32 = arith.negf %31 : vector<1x128xf32>
    %33 = math.exp %32 : vector<1x128xf32>
    %cst_16 = arith.constant 1.000000e+00 : f32
    %34 = vector.broadcast %cst_16 : f32 to vector<1x128xf32>
    %35 = arith.addf %34, %33 : vector<1x128xf32>
    %36 = arith.divf %34, %35 : vector<1x128xf32>
    %cst_17 = arith.constant 5.000000e+00 : f32
    %37 = vector.broadcast %cst_17 : f32 to vector<1x128xf32>
    %38 = arith.mulf %36, %37 : vector<1x128xf32>
    %c0_18 = arith.constant 0 : index
    %c0_19 = arith.constant 0 : index
    %39 = vector.load %arg8[%c0_18, %c0_19] : memref<1x128xf32, #tpu.memory_space<vmem>>, vector<1x128xf32>
    tpu.vector_store %arg8[%c0_18, %c0_19], %38 {strides = array<i32>} : memref<1x128xf32, #tpu.memory_space<vmem>>, vector<1x128xf32>,
    return
  }
  func.func @transform_0(%arg0: i32) -> (i32, i32) {
    %c0_i32 = arith.constant 0 : i32
    %c0_i32_0 = arith.constant 0 : i32
    return %c0_i32, %arg0 : i32, i32
  }
  func.func @transform_1(%arg0: i32) -> (i32, i32) {
    %c0_i32 = arith.constant 0 : i32
    %c0_i32_0 = arith.constant 0 : i32
    return %c0_i32, %arg0 : i32, i32
  }
  func.func @transform_2(%arg0: i32) -> (i32, i32) {
    %c0_i32 = arith.constant 0 : i32
    %c0_i32_0 = arith.constant 0 : i32
    %c0_i32_1 = arith.constant 0 : i32
    return %c0_i32, %c0_i32_0 : i32, i32
  }
  func.func @transform_3(%arg0: i32) -> (i32, i32) {
    %c0_i32 = arith.constant 0 : i32
    %c0_i32_0 = arith.constant 0 : i32
    %c0_i32_1 = arith.constant 0 : i32
    return %c0_i32, %c0_i32_0 : i32, i32
  }
  func.func @transform_4(%arg0: i32) -> (i32, i32) {
    %c0_i32 = arith.constant 0 : i32
    %c0_i32_0 = arith.constant 0 : i32
    %c0_i32_1 = arith.constant 0 : i32
    return %c0_i32, %c0_i32_0 : i32, i32
  }
  func.func @transform_5(%arg0: i32) -> (i32, i32) {
    %c0_i32 = arith.constant 0 : i32
    %c0_i32_0 = arith.constant 0 : i32
    %c0_i32_1 = arith.constant 0 : i32
    return %c0_i32, %c0_i32_0 : i32, i32
  }
  func.func @transform_6(%arg0: i32) -> (i32, i32) {
    %c0_i32 = arith.constant 0 : i32
    %c0_i32_0 = arith.constant 0 : i32
    %c0_i32_1 = arith.constant 0 : i32
    return %c0_i32, %c0_i32_0 : i32, i32
  }
  func.func @transform_7(%arg0: i32) -> (i32, i32) {
    %c0_i32 = arith.constant 0 : i32
    %c0_i32_0 = arith.constant 0 : i32
    return %c0_i32, %arg0 : i32, i32
  }
}

</mosaic_0001>

<bundles_post_ra>
// kernel: tpu_custom_call.1
= control target key start
LH: loop header
LB: loop body
LE: loop exit
PB: predicated region body
PF: predicated region fallthrough
CT: control target
= control target key end

     0   :  { %s1149_s0 = inlined_call_operand.vmem [shape: s32[1,256], index: 0, kind: input, shape index: {}]   ;;  %s1150_s1 = inlined_call_operand.vmem [shape: s32[1,256], index: 1, kind: input, shape index: {}]   ;;  %s1151_s2 = inlined_call_operand.vmem [shape: bf16[64,10], index: 2, kind: input, shape index: {}]   ;;  %s1152_s3 = inlined_call_operand.vmem [shape: bf16[64,5], index: 3, kind: input, shape index: {}]   ;;  %s1153_s4 = inlined_call_operand.vmem [shape: f32[64,1], index: 4, kind: input, shape index: {}]   ;;  %s1154_s5 = inlined_call_operand.vmem [shape: f32[64,1], index: 5, kind: input, shape index: {}]   ;;  %s1155_s6 = inlined_call_operand.<no memory space> [shape: f32[1,1], index: 6, kind: input, shape index: {}]   ;;  %s1156_s7 = inlined_call_operand.hbm [shape: f32[1,256], index: 7, kind: output, shape index: {}]  }
   0x1   :  { %12 = sst [smem:[#allocation2]] %s1155_s6 }
   0x2   :  { %13 = vsyncpa [#allocation4], 0 }
   0x3   :  { %15 = vsyncpa [#allocation4 + $0x1], 0  ;;  %s976_s26 = smov 0   ;;  %s978_s27 = smov 0  }
   0x4   :  { %s980_s28 = smov 0   ;;  %s982_s29 = smov 0  }
   0x5 LB: > { %s997_s6 = sadd.s32 4294967295, %s927_s29   ;;  %s751_s30 = sadd.s32 4294967294, %s927_s29   ;;  %s927_s29 = sphi %s982_s29, %s1162_s29   ;;  %s923_s28 = sphi %s980_s28, %s1161_s28   ;;  %s919_s27 = sphi %s978_s27, %s1160_s27   ;;  %s915_s26 = sphi %s976_s26, %s1159_s26  }
   0x6   : > { %s1001_s8 = sadd.s32 1, %s927_s29   ;;  %s185_s9 = sadd.s32 1, %s923_s28 }
   0x7   : > { %s182_s10 = ssub.s32 %s927_s29, %s1001_s8  ;;  %p195_p0 = scmp.ne.s32.totalorder %s923_s28, %s919_s27 }
   0x8   : > { %p183_p1 = scmp.eq.s32.totalorder %s182_s10, 0  ;;  %p196_p2 = scmp.eq.s32.totalorder %s997_s6, 1 }
   0x9   : > { %p201_p3 = scmp.ne.s32.totalorder %s919_s27, %s915_s26  ;;  %p202_p4 = scmp.eq.s32.totalorder %s751_s30, 1 }
   0xa   : > { %s1012_s11 = scalar_select %p183_p1, %s923_s28, %s185_s9  }
   0xb   : > { %p1014_p5 = por %p196_p2, %p195_p0  ;;  %p1018_p6 = por %p202_p4, %p201_p3 }
   0xc   : > { %p754_p7 = scmp.ge.s32.totalorder %s927_s29, 1  ;;  %p247_p8 = scmp.lt.s32.totalorder %s927_s29, 3 }
   0xe   : > { %p248_p9 = pnand %p754_p7, %p247_p8 }
   0xf   : > { %p279_p10 = scmp.lt.s32.totalorder (!%p248_p9), %s997_s6, 1  ;;  %s277_s25 = sand.u32 (!%p248_p9), 1, %s919_s27  }
  0x10   : > { %251 = sbr.rel (%p248_p9) target bundleno = 318 (0x13e), region = 48  ;;  %s777_s30 = sshll.u32 (!%p248_p9), %s997_s6, 4 }
  0x11   : > { %s278_s9 = scalar_lea.vmem (!%p248_p9), [#allocation3], %s277_s25  ;;  %s678_s17 = scalar_lea.sflag (!%p248_p9), [#allocation4], %s277_s25 }
  0x12   : > { %s690_s10 = sshll.u32 (!%p248_p9), %s278_s9, 4  ;;  %s932_s19 = smov (!%p248_p9), [#allocation3]   ;;  %s691_s10 = int_to_ptr.vmem [resolvable:$true] %s690_s10 }
  0x13   : > { %s867_s18 = scalar_lea.vmem (!%p248_p9), %s691_s10, 16  ;;  %s871_s20 = sshll.u32 (!%p248_p9), %s932_s19, 4  ;;  %s872_s20 = int_to_ptr.vmem [resolvable:$false] %s871_s20 }
  0x14   : > { %p868_p11 = scmp.ne.s32.totalorder (!%p248_p9), %s691_s10, %s867_s18  ;;  %p874_p0 = scmp.lt.s32.totalorder (!%p248_p9), %s691_s10, %s872_s20 }
  0x15   : > { %v288_v0 = vlaneseq  ;;  %vm359_vm0 = vcmask 1041408   ;;  %v855_v1 = vld [vmem:[%s1151_s2] sm:$0xff]   ;;  %vm451_vm1 = vcmask 80896   ;;  %s280_s16 = scalar_select %p279_p10, %s997_s6, 1  ;;  %vm464_vm2 = vcmask 1044480   ;;  %v856_v19 = vld [vmem:[%s1151_s2 + $0x8] sm:$0xff]  }
  0x16   : > { %vm360_vm3 = vcmask 1042432   ;;  %v929_v3 = vmov 65535   ;;  %802 = vmatprep.mubr.msk.bf16.mxu1 %vm451_vm1, %v855_v1  ;;  %v857_v5 = vld [vmem:[%s1152_s3] sm:$0xff]   ;;  %vm346_vm4 = vcmask 39936   ;;  %v930_v9 = vmov 0.0   ;;  %v859_v21 = vld [vmem:[%s1151_s2 + $0x10] sm:$0xff]   ;;  %p869_p12 = pnand %p868_p11, %p1014_p5 }
  0x17   : > { %v289_v2 = vshrl.u32 %v288_v0, 7  ;;  %v361_v4 = vsel %vm359_vm0, 4294967295, %v929_v3  ;;  %s281_s21 = scalar_lea.vmem %s1149_s0, %s280_s16  ;;  %s284_s24 = scalar_lea.vmem %s1150_s1, %s280_s16  ;;  %792 = vmatprep.mubr.msk.bf16.mxu0 %vm346_vm4, %v857_v5  ;;  %v931_v14 = vmov 0   ;;  %v533_v20 = vld [vmem:[%s1153_s4] sm:$0xff]  ;;  %v535_v22 = vld [vmem:[%s1153_s4 + $0x10] sm:$0xff]  ;;  %v858_v23 = vld [vmem:[%s1152_s3 + $0x8] sm:$0xff]  }
  0x18   : > { %v755_v7 = vld [vmem:[%s281_s21] ss:$0 sm:$0xff]  ;;  %v362_v13 = vsel %vm360_vm3, %v361_v4, 0  ;;  %853 = vset.pattern.permute.xlu0 %v931_v14  ;;  %854 = vset.pattern.permute.xlu1 %v931_v14  ;;  %v534_v24 = vld [vmem:[%s1153_s4 + $0x8] sm:$0xff]  ;;  %v861_v25 = vld [vmem:[%s1152_s3 + $0x10] sm:$0xff]   ;;  %s688_s16 = scalar_lea.hbm %s1156_s7, %s777_s30  ;;  %p870_p13 = pneg %p869_p12 }
  0x19   : > { %v290_v6 = vadd.s32 8, %v289_v2  ;;  %v758_v8 = vld [vmem:[%s284_s24] ss:$0 sm:$0xff]  ;;  %vm295_vm5 = vcmp.eq.s32.totalorder %v289_v2, %v755_v7  ;;  %543 = vperm.xlu0 %853, %v533_v20   ;;  %553 = vperm.xlu1 %854, %v535_v22   ;;  %v536_v26 = vld [vmem:[%s1153_s4 + $0x18] sm:$0xff]  ;;  %v598_v28 = vld [vmem:[%s1154_s5 + $0x8] sm:$0xff]  ;;  %s666_s24 = sld [smem:[#allocation2]] }
  0x1a   : > { %vm306_vm7 = vcmp.eq.s32.totalorder %v289_v2, %v758_v8  ;;  %v756_v10 = vsel %vm295_vm5, 1.0, %v930_v9  ;;  %v597_v27 = vld [vmem:[%s1154_s5] sm:$0xff]  ;;  %v860_v29 = vld [vmem:[%s1151_s2 + $0x18] sm:$0xff]   ;;  %v599_v32 = vld [vmem:[%s1154_s5 + $0x10] sm:$0xff]  ;;  %s873_s6 = scalar_lea.vmem %s872_s20, 32 }
  0x1b   : > { %vm296_vm6 = vcmp.eq.s32.totalorder %v290_v6, %v755_v7  ;;  %v759_v12 = vsel %vm306_vm7, 1.0, %v930_v9  ;;  %v862_v30 = vld [vmem:[%s1152_s3 + $0x18] sm:$0xff]   ;;  %v537_v31 = vld [vmem:[%s1153_s4 + $0x20] sm:$0xff]  ;;  %v538_v33 = vld [vmem:[%s1153_s4 + $0x28] sm:$0xff]  ;;  %p875_p1 = scmp.lt.s32.totalorder %s873_s6, %s867_s18 }
  0x1c   : > { %v757_v11 = vsel %vm296_vm6, 1.0, %v930_v9  ;;  %v309_v16 = vpack.c.bf16 %v759_v12, %v759_v12  ;;  %v600_v34 = vld [vmem:[%s1154_s5 + $0x18] sm:$0xff]  ;;  %v539_v35 = vld [vmem:[%s1153_s4 + $0x30] sm:$0xff]  ;;  %v601_v36 = vld [vmem:[%s1154_s5 + $0x20] sm:$0xff] }
  0x1d   : > { %v301_v15 = vpack.c.bf16 %v757_v11, %v756_v10  ;;  %548 = vperm.xlu0 %853, %v534_v24   ;;  %558 = vperm.xlu1 %854, %v536_v26   ;;  %v540_v37 = vld [vmem:[%s1153_s4 + $0x38] sm:$0xff]  ;;  %v602_v38 = vld [vmem:[%s1154_s5 + $0x28] sm:$0xff]  ;;  %v603_v39 = vld [vmem:[%s1154_s5 + $0x30] sm:$0xff]  ;;  %p876_p2 = por %p875_p1, %p874_p0 }
  0x1e   : > { %v364_v18 = vand.u32 %v362_v13, %v309_v16  ;;  %v604_v40 = vld [vmem:[%s1154_s5 + $0x38] sm:$0xff] }
  0x1f   : > { %810 = vmatprep.subr.msk.bf16.mxu1 %vm464_vm2, %v301_v15  ;;  %v466_v17 = vsel %vm464_vm2, %v301_v15, 0  ;;  %p877_p3 = pnand %p876_p2, %p870_p13 }
  0x20   : > { %801 = vmatpush3.bf16.msra.mxu1 %v466_v17  ;;  %790 = vmatprep.subr.bf16.mxu0 %v364_v18 }
  0x21   : > { %791 = vmatpush3.bf16.msra.mxu0 %v364_v18  ;;  %607 = vperm.xlu0 %853, %v597_v27  }
  0x22   : > { %612 = vperm.xlu1 %854, %v598_v28  }
  0x23   : > { %803 = vmatmul.mubr.msk.bf16.vlgmr.msra.gmra.mxu1 %vm451_vm1, %v856_v19 }
  0x24   : > { %806 = vmatprep.mubr.msk.bf16.mxu1 %vm451_vm1, %v859_v21  ;;  %793 = vmatmul.mubr.msk.bf16.vlgmr.msra.gmra.mxu0 %vm346_vm4, %v858_v23 }
  0x25   : > { %796 = vmatprep.mubr.msk.bf16.mxu0 %vm346_vm4, %v861_v25  ;;  %563 = vperm.xlu0 %853, %v537_v31  }
  0x26   : > { %617 = vperm.xlu1 %854, %v599_v32  }
  0x29   : > { %568 = vperm.xlu0 %853, %v538_v33  }
  0x2a   : > { %622 = vperm.xlu1 %854, %v600_v34  }
  0x2b   : > { %807 = vmatmul.mubr.msk.bf16.gmra.mxu1 %vm451_vm1, %v860_v29 }
  0x2c   : > { %797 = vmatmul.mubr.msk.bf16.gmra.mxu0 %vm346_vm4, %v862_v30 }
  0x2d   : > { %573 = vperm.xlu0 %853, %v539_v35  }
  0x2e   : > { %627 = vperm.xlu1 %854, %v601_v36  }
  0x31   : > { %578 = vperm.xlu0 %853, %v540_v37  }
  0x32   : > { %632 = vperm.xlu1 %854, %v602_v38  }
  0x35   : > { %637 = vperm.xlu0 %853, %v603_v39  }
  0x36   : > { %642 = vperm.xlu1 %854, %v604_v40  }
  0x94   : > { %v544_v41 = vpop.permute.xlu0 %543  ;;  %v554_v42 = vpop.permute.xlu1 %553 }
  0x98   : > { %v549_v43 = vpop.permute.xlu0 %548  ;;  %v559_v44 = vpop.permute.xlu1 %558 }
  0x9c   : > { %v608_v45 = vpop.permute.xlu0 %607 }
  0x9d   : > { %v613_v46 = vpop.permute.xlu1 %612 }
  0xa0   : > { %v564_v48 = vpop.permute.xlu0 %563 }
  0xa1   : > { %v618_v51 = vpop.permute.xlu1 %617 }
  0xa4   : > { %v569_v58 = vpop.permute.xlu0 %568 }
  0xa5   : > { %v623_v63 = vpop.permute.xlu1 %622 }
  0xa8   : > { %v574_v8 = vpop.permute.xlu0 %573 }
  0xa9   : > { %v628_v15 = vpop.permute.xlu1 %627 }
  0xac   : > { %v579_v28 = vpop.permute.xlu0 %578 }
  0xad   : > { %v633_v33 = vpop.permute.xlu1 %632 }
  0xe3   : > { %v804_v47 = vpop.f32.mrf.mxu1 }
  0xe4   : > { %v794_v49 = vpop.f32.mrf.mxu0 }
  0xe5   : > { %v502_v50 = vpop.f32.mrf.mxu1  ;;  %v511_v54 = vadd.f32 %v804_v47, %v794_v49 }
  0xe6   : > { %v400_v52 = vpop.f32.mrf.mxu0 }
  0xe7   : > { %v805_v53 = vpop.f32.mrf.mxu1  ;;  %v503_v55 = vadd.f32 %v502_v50, %v400_v52  ;;  %v583_v0 = vadd.f32 %v554_v42, %v511_v54 }
  0xe8   : > { %v795_v56 = vpop.f32.mrf.mxu0 }
  0xe9   : > { %v505_v57 = vpop.f32.mrf.mxu1  ;;  %v581_v59 = vadd.f32 %v544_v41, %v503_v55  ;;  %v514_v60 = vadd.f32 %v805_v53, %v795_v56  ;;  %v591_v9 = vmax.f32 %v583_v0, 0.0  ;;  %v638_v41 = vpop.permute.xlu0 %637  ;;  %v667_v53 = vstv %s666_s24 }
  0xea   : > { %v403_v61 = vpop.f32.mrf.mxu0 }
  0xeb   : > { %v808_v62 = vpop.f32.mrf.mxu1  ;;  %v506_v1 = vadd.f32 %v505_v57, %v403_v61  ;;  %v589_v4 = vmax.f32 %v581_v59, 0.0  ;;  %v584_v5 = vadd.f32 %v559_v44, %v514_v60  ;;  %v647_v22 = vmul.f32 %v618_v51, %v591_v9  ;;  %v643_v44 = vpop.permute.xlu1 %642 }
  0xec   : > { %v798_v2 = vpop.f32.mrf.mxu0 }
  0xed   : > { %v518_v3 = vpop.f32.mrf.mxu1  ;;  %v582_v6 = vadd.f32 %v549_v43, %v506_v1  ;;  %v527_v13 = vadd.f32 %v808_v62, %v798_v2  ;;  %v645_v16 = vmul.f32 %v608_v45, %v589_v4  ;;  %v592_v17 = vmax.f32 %v584_v5, 0.0 }
  0xee   : > { %v416_v7 = vpop.f32.mrf.mxu0 }
  0xef   : > { %v590_v10 = vmax.f32 %v582_v6, 0.0  ;;  %v519_v11 = vadd.f32 %v518_v3, %v416_v7  ;;  %v809_v12 = vpop.f32.mrf.mxu1  ;;  %v587_v26 = vadd.f32 %v574_v8, %v527_v13  ;;  %v648_v29 = vmul.f32 %v623_v63, %v592_v17 }
  0xf0   : > { %v799_v14 = vpop.f32.mrf.mxu0 }
  0xf1   : > { %v646_v18 = vmul.f32 %v613_v46, %v590_v10  ;;  %v585_v19 = vadd.f32 %v564_v48, %v519_v11  ;;  %v530_v20 = vadd.f32 %v809_v12, %v799_v14  ;;  %v521_v25 = vpop.f32.mrf.mxu1  ;;  %v595_v36 = vmax.f32 %v587_v26, 0.0 }
  0xf2   : > { %v419_v21 = vpop.f32.mrf.mxu0 }
  0xf3   : > { %v653_v23 = vadd.f32 %v646_v18, %v645_v16  ;;  %v593_v24 = vmax.f32 %v585_v19, 0.0  ;;  %v522_v27 = vadd.f32 %v521_v25, %v419_v21  ;;  %v588_v31 = vadd.f32 %v579_v28, %v530_v20 }
  0xf4   : > { %v651_v42 = vmul.f32 %v638_v41, %v595_v36 }
  0xf5   : > { %v654_v30 = vadd.f32 %v653_v23, %v647_v22  ;;  %v586_v32 = vadd.f32 %v569_v58, %v522_v27  ;;  %v649_v34 = vmul.f32 %v628_v15, %v593_v24  ;;  %v596_v39 = vmax.f32 %v588_v31, 0.0 }
  0xf7   : > { %v655_v35 = vadd.f32 %v654_v30, %v648_v29  ;;  %v594_v37 = vmax.f32 %v586_v32, 0.0  ;;  %v652_v45 = vmul.f32 %v643_v44, %v596_v39 }
  0xf9   : > { %v656_v38 = vadd.f32 %v655_v35, %v649_v34  ;;  %v650_v40 = vmul.f32 %v633_v33, %v594_v37 }
  0xfb   : > { %v657_v43 = vadd.f32 %v656_v38, %v650_v40 }
  0xfd   : > { %v658_v46 = vadd.f32 %v657_v43, %v651_v42 }
  0xff   : > { %v659_v47 = vadd.f32 %v658_v46, %v652_v45 }
 0x101   : > { %v660_v48 = vrot.slane %v659_v47, 4 }
 0x103   : > { %v661_v49 = vadd.f32 %v660_v48, %v659_v47 }
 0x105   : > { %v662_v50 = vrot.slane %v661_v49, 2 }
 0x107   : > { %v663_v51 = vadd.f32 %v662_v50, %v661_v49 }
 0x109   : > { %v664_v52 = vrot.slane %v663_v51, 1 }
 0x10b   : > { %v665_v54 = vadd.f32 %v664_v52, %v663_v51 }
 0x10d   : > { %v668_v55 = vadd.f32 %v667_v53, %v665_v54 }
 0x10f   : > { %v776_v56 = vmul.f32 -1.442695, %v668_v55 }
 0x111   : > { %863 = vpow2.f32 %v776_v56 }
 0x11e   : > { %v864_v57 = vpop.eup %863 }
 0x11f   : > { %v672_v58 = vadd.f32 1.0, %v864_v57 }
 0x121   : > { %865 = vrcp.f32 %v672_v58 }
 0x12e   : > { %v866_v59 = vpop.eup %865 }
 0x12f   : > { %v675_v60 = vmul.f32 5.0, %v866_v59 }
 0x131   : > { %676 = vst [vmem:[%s278_s9] sm:$0x1] %v675_v60 }
 0x132   : > { %880 = shalt.err (!%p877_p3)
}
 0x133   : > { %s881_s21 = scalar_lea.hbm %s688_s16, 16  ;;  %s885_s24 = scalar_lea.hbm %s1156_s7, 32 }
 0x134   : > { %p882_p4 = scmp.ne.s32.totalorder %s688_s16, %s881_s21  ;;  %p886_p9 = scmp.lt.s32.totalorder %s688_s16, %s1156_s7 }
 0x135   : > { %p887_p10 = scmp.lt.s32.totalorder %s885_s24, %s881_s21 }
 0x136   : > { %p883_p7 = pnand %p882_p4, %p1014_p5 }
 0x137   : > { %p888_p11 = por %p887_p10, %p886_p9 }
 0x138   : > { %p884_p8 = pneg %p883_p7 }
 0x13a   : > { %p889_p12 = pnand %p888_p11, %p884_p8 }
 0x13c   : > { %892 = shalt.err (!%p889_p12)
}
 0x13d   : > { %811 = dma.vmem_to_hbm [thread:$0]  (%p1014_p5), %s691_s10, 16, %s688_s16, %s678_s17  }
 0x13e PF: > { %p817_p13 = scmp.ge.s32.totalorder %s927_s29, 2  ;;  %s702_s9 = sand.u32 1, %s915_s26  }
 0x13f   : > { %s703_s14 = scalar_lea.sflag [#allocation4], %s702_s9 }
 0x140   : > { %p814_p0 = pnand %p817_p13, %p1018_p6 }
 0x142   : > { %p815_p1 = pneg %p814_p0 }
 0x144   : > { %910 = dma.done.wait (%p815_p1), %s703_s14, 16  }
 0x145   : > { %912 = vsyncadd (%p815_p1), %s703_s14, 4294967280  ;;  %p18_p2 = scmp.ge.s32.totalorder %s1001_s8, 4   ;;  %s1159_s26 = smov %s919_s27 }
 0x146   : > { %s1160_s27 = smov %s923_s28  ;;  %s1161_s28 = smov %s1012_s11 }
 0x147   : > { %s1162_s29 = smov %s1001_s8  ;;  %20 = sbr.rel (!%p18_p2) target bundleno = 5 (0x5), region = 86 }
 0x14c   :  { %707 = vsyncpa [#allocation4], 1 }
 0x14d   :  { %709 = vsyncpa [#allocation4 + $0x1], 1 }

</bundles_post_ra>
